<compile_context>
chip_gen: v7x
topology: tpu7x:2x2x1
jax: 0.10.0
libtpu: 0.0.40
codegen_flags: <defaults>
</compile_context>

<pallas_src>
import jax
import jax.numpy as jnp
from jax.experimental import pallas as pl
from jax.experimental.pallas import tpu as pltpu


def _leaky(y):
    # leaky_relu(0.2): max(y, 0.2*y) == where(y >= 0, y, 0.2*y)
    return jnp.maximum(y, 0.2 * y)


# ----------------------------------------------------------------------------
# Fused kernel builder.  One grid step processes `nb` samples.
# Transposed dataflow: every activation is (C, n_pos*nb) with lane index
# pos*nb + sample; nb is (usually) a multiple of 128 so per-position lane
# slices sit on vreg boundaries.
#   conv1   : (C1, K1) @ (K1, p1*nb) single MXU matmul on the prefetched,
#             lane-dense, bf16 patch block.
#   conv>=2 : k*k accumulating matmuls (C_out, C_in) @ (C_in, n_pos*nb); the
#             RHS per kernel tap is a lane concatenation of the VMEM-resident
#             previous activation's position slices (free-ish vreg moves).
#   fc      : sum over spatial positions of (out, C_L) @ (C_L, nb) matmuls;
#             torch's NCHW flatten order is absorbed into the wrapper-side
#             permutation of the fc weight.
# Activations never leave VMEM; only the final lane-dense (out, nb) block is
# stored.
# ----------------------------------------------------------------------------
def _make_fused_kernel(nb, conv_meta, p_last, out_size):
    n_later = len(conv_meta)

    def kernel(*refs):
        p_ref, w1_ref, b1_ref = refs[0], refs[1], refs[2]
        conv_refs = refs[3:3 + 2 * n_later]
        fcw_ref, fcb_ref, out_ref = refs[-3], refs[-2], refs[-1]

        # ---- conv1: (C1, K1) @ (K1, p1*nb), f32 accumulate ----
        a = jnp.dot(w1_ref[...], p_ref[0], preferred_element_type=jnp.float32)
        a = _leaky(a + b1_ref[...])          # bias (C1, 1) broadcasts over lanes
        prev = a.astype(jnp.bfloat16)        # (C1, p1*nb)

        # ---- conv layers >= 2: per-tap batched, accumulating matmuls ----
        for li, meta in enumerate(conv_meta):
            w_all = conv_refs[2 * li][...]        # (k*k, C_out, C_in) bf16
            bias = conv_refs[2 * li + 1][...]     # (C_out, 1) f32
            k, s, w_in = meta["k"], meta["stride"], meta["w_in"]
            h_out, w_out = meta["h_out"], meta["w_out"]
            acc = None
            for i in range(k):
                for j in range(k):
                    parts = []
                    for ho in range(h_out):
                        for wo in range(w_out):
                            r = (ho * s + i) * w_in + (wo * s + j)
                            parts.append(prev[:, r * nb:(r + 1) * nb])
                    rhs = parts[0] if len(parts) == 1 else jnp.concatenate(parts, axis=1)
                    t = jnp.dot(w_all[i * k + j], rhs,
                                preferred_element_type=jnp.float32)
                    acc = t if acc is None else acc + t
            a = _leaky(acc + bias)                # bias + leaky once per layer
            prev = a.astype(jnp.bfloat16)         # (C_out, h_out*w_out*nb)

        # ---- fc (no activation): out = b + sum_pos W_pos @ act_pos ----
        fcw = fcw_ref[...]                        # (P_L, out, C_L) bf16
        out = jnp.zeros((out_size, nb), jnp.float32)
        for pos in range(p_last):
            out = out + jnp.dot(fcw[pos], prev[:, pos * nb:(pos + 1) * nb],
                                preferred_element_type=jnp.float32)
        out = out + fcb_ref[...]                  # (out, 1) broadcasts over lanes
        out_ref[0] = out.astype(out_ref.dtype)    # lane-dense (out, nb) store

    return kernel


# ----------------------------------------------------------------------------
# Wrapper-side im2col for conv1 only (pure layout transform of the input,
# fused by XLA into the HBM read).  Feature order = c*kh*kw + i*kw + j,
# matching torch weight.reshape(C_out, -1).
# ----------------------------------------------------------------------------
def _im2col(x, kh, kw, stride):
    n, c, h, w = x.shape
    ho = (h - kh) // stride + 1
    wo = (w - kw) // stride + 1
    patches = []
    for i in range(kh):
        for j in range(kw):
            patches.append(
                x[:, :, i:i + stride * ho:stride, j:j + stride * wo:stride])
    p = jnp.stack(patches, axis=2)                   # (N, C, kh*kw, Ho, Wo)
    p = p.reshape(n, c * kh * kw, ho, wo)
    p = p.transpose(0, 2, 3, 1).reshape(n, ho * wo, c * kh * kw)
    return p, ho, wo


def cnn_map_encoder_forward(params, x, training=False):
    """x: (N, C, H, W) float32 (NCHW, matches PyTorch). Returns (N, output)."""
    del training  # stock CNNMapEncoder has no dropout / train-only behaviour
    convs = params["convs"]
    n, c0, _, _ = x.shape
    out_size = params["fc_w"].shape[0]

    # ---------------- conv1 preprocessing (XLA side) ----------------
    c1, _, k1, _ = convs[0]["w"].shape
    s1 = convs[0]["stride"]
    patches, h1, w1 = _im2col(x, k1, k1, s1)         # (N, P1, K1), f32
    p1 = h1 * w1
    k1_feat = c0 * k1 * k1                           # NOT padded in HBM

    # batch blocking: nb samples per grid step (multiple of 128 for lane-dense
    # activations and vreg-aligned per-position slices).  Halve only if the
    # double-buffered bf16 patch block would blow v5e's 16 MiB scoped VMEM.
    nb = 128 if n > 8 else 8
    while nb > 8 and 2 * (k1_feat * p1 * nb * 2) > (8 << 20):
        nb //= 2
    n_blocks = -(-n // nb)
    n_pad = n_blocks * nb

    patches = jnp.pad(patches, ((0, n_pad - n), (0, 0), (0, 0)))
    # transposed layout per block: (K1, p1*nb) with lane index = pos*nb + sample
    p1r = patches.reshape(n_blocks, nb, p1, k1_feat).transpose(0, 3, 2, 1)
    p1r = p1r.reshape(n_blocks, k1_feat, p1 * nb).astype(jnp.bfloat16)

    w1m = convs[0]["w"].reshape(c1, k1_feat).astype(jnp.bfloat16)   # (C1, K1)
    b1m = convs[0]["b"].reshape(c1, 1)                               # f32

    # ---------------- later conv layers ----------------
    conv_meta, conv_args, conv_specs = [], [], []
    h_prev, w_prev, c_prev = h1, w1, c1
    flops = 2 * c1 * k1_feat * p1 * nb
    for conv in convs[1:]:
        c_out, c_in, k, _ = conv["w"].shape
        s = conv["stride"]
        h_out = (h_prev - k) // s + 1
        w_out = (w_prev - k) // s + 1
        conv_meta.append(dict(k=k, stride=s, w_in=w_prev,
                              h_out=h_out, w_out=w_out))
        # tap-major weights: wr[i*k+j] = W[:, :, i, j]  -> (C_out, C_in)
        wr = conv["w"].transpose(2, 3, 0, 1).reshape(k * k, c_out, c_in)
        wr = wr.astype(jnp.bfloat16)
        br = conv["b"].reshape(c_out, 1)
        conv_args += [wr, br]
        conv_specs += [
            pl.BlockSpec((k * k, c_out, c_in), lambda i: (0, 0, 0)),
            pl.BlockSpec((c_out, 1), lambda i: (0, 0)),
        ]
        flops += 2 * c_out * c_in * k * k * h_out * w_out * nb
        h_prev, w_prev, c_prev = h_out, w_out, c_out

    # ---------------- fc ----------------
    p_last = h_prev * w_prev
    # torch flatten feature order is c*P_L + pos -> pre-permute weight to
    # (P_L, out, C_L) so the kernel does out += fcw[pos] @ act[:, pos-slice]
    fcw = params["fc_w"].reshape(out_size, c_prev, p_last).transpose(2, 0, 1)
    fcw = fcw.astype(jnp.bfloat16)
    fcb = params["fc_b"].reshape(out_size, 1)
    flops += 2 * out_size * c_prev * p_last * nb
    flops *= n_blocks

    args = [p1r, w1m, b1m] + conv_args + [fcw, fcb]
    in_specs = [
        pl.BlockSpec((1, k1_feat, p1 * nb), lambda i: (i, 0, 0)),
        pl.BlockSpec((c1, k1_feat), lambda i: (0, 0)),
        pl.BlockSpec((c1, 1), lambda i: (0, 0)),
    ] + conv_specs + [
        pl.BlockSpec((p_last, out_size, c_prev), lambda i: (0, 0, 0)),
        pl.BlockSpec((out_size, 1), lambda i: (0, 0)),
    ]
    out_spec = pl.BlockSpec((1, out_size, nb), lambda i: (i, 0, 0))

    bytes_accessed = int(sum(int(a.size) * a.dtype.itemsize for a in args)
                         + n_blocks * out_size * nb * 4)
    kernel = _make_fused_kernel(nb, conv_meta, p_last, out_size)

    out = pl.pallas_call(
        kernel,
        out_shape=jax.ShapeDtypeStruct((n_blocks, out_size, nb), jnp.float32),
        grid_spec=pltpu.PrefetchScalarGridSpec(
            num_scalar_prefetch=0,
            grid=(n_blocks,),
            in_specs=in_specs,
            out_specs=out_spec,
        ),
        compiler_params=pltpu.CompilerParams(
            dimension_semantics=("parallel",)),
        cost_estimate=pl.CostEstimate(flops=int(flops), transcendentals=0,
                                      bytes_accessed=bytes_accessed),
    )(*args)

    # (n_blocks, out, nb) -> (n_blocks, nb, out) -> (n_pad, out) -> slice pad
    out = out.transpose(0, 2, 1).reshape(n_pad, out_size)
    return out[:n]


# ----------------------------------------------------------------------------
# Parameter init (shapes match the PyTorch module) + plain-XLA reference
# ----------------------------------------------------------------------------
def init_cnn_map_encoder(key, map_channels, hidden_channels, output_size,
                         masks, strides, patch_size):
    patch_x = patch_size[0] + patch_size[2]
    patch_y = patch_size[1] + patch_size[3]
    params = {"convs": []}
    h, w = patch_x, patch_y
    in_ch = map_channels
    for i, out_ch in enumerate(hidden_channels):
        k = masks[i]
        s = strides[i]
        key, kw_, kb_ = jax.random.split(key, 3)
        wgt = 0.1 * jax.random.normal(kw_, (out_ch, in_ch, k, k), jnp.float32)
        b = 0.1 * jax.random.normal(kb_, (out_ch,), jnp.float32)
        params["convs"].append({"w": wgt, "b": b, "stride": s})
        h = (h - k) // s + 1
        w = (w - k) // s + 1
        in_ch = out_ch
    flat = in_ch * h * w
    key, kw_, kb_ = jax.random.split(key, 3)
    params["fc_w"] = 0.1 * jax.random.normal(kw_, (output_size, flat), jnp.float32)
    params["fc_b"] = 0.1 * jax.random.normal(kb_, (output_size,), jnp.float32)
    return params


def _reference_forward(params, x):
    y = x
    for conv in params["convs"]:
        y = jax.lax.conv_general_dilated(
            y, conv["w"], window_strides=(conv["stride"],) * 2,
            padding="VALID", dimension_numbers=("NCHW", "OIHW", "NCHW"))
        y = y + conv["b"][None, :, None, None]
        y = jnp.maximum(y, 0.2 * y)
    y = y.reshape(y.shape[0], -1)
    return y @ params["fc_w"].T + params["fc_b"][None, :]


if __name__ == "__main__":
    # Small config consistent with the module's __init__:
    map_channels = 4
    hidden_channels = [8, 8]
    output_size = 32
    masks = [5, 3]
    strides = [2, 2]
    patch_size = (8, 8, 8, 8)   # -> 16 x 16 input patch

    key = jax.random.PRNGKey(0)
    key, kp, kx = jax.random.split(key, 3)
    params = init_cnn_map_encoder(kp, map_channels, hidden_channels,
                                  output_size, masks, strides, patch_size)

    batch = 2
    x = jax.random.normal(kx, (batch, map_channels, 16, 16), jnp.float32)

    out = cnn_map_encoder_forward(params, x, training=True)
    jax.block_until_ready(out)
    assert out.shape == (batch, output_size), out.shape

    ref = _reference_forward(params, x)
    err = float(jnp.max(jnp.abs(out - ref)))
    # bf16 patch/weight streams -> slightly looser tolerance than pure f32
    assert err < 5e-2, f"max abs err vs XLA reference = {err}"
    print("KERNEL_OK")
</pallas_src>

<mosaic_0001>
module attributes {stable_mosaic.version = 11 : i64} {
  func.func @kernel(%arg0: i32, %arg1: memref<1x100x288xbf16, #tpu.memory_space<vmem>>, %arg2: memref<8x100xbf16, #tpu.memory_space<vmem>>, %arg3: memref<8x1xf32, #tpu.memory_space<vmem>>, %arg4: memref<9x8x8xbf16, #tpu.memory_space<vmem>>, %arg5: memref<8x1xf32, #tpu.memory_space<vmem>>, %arg6: memref<4x32x8xbf16, #tpu.memory_space<vmem>>, %arg7: memref<32x1xf32, #tpu.memory_space<vmem>>, %arg8: memref<1x32x8xf32, #tpu.memory_space<vmem>>) attributes {dimension_semantics = [#tpu.dimension_semantics<parallel>], iteration_bounds = array<i64: 1>, scalar_prefetch = 0 : i64, scratch_operands = 0 : i64, tpu.core_type = #tpu.core_type<tc>, window_params = [{transform_indices = @transform_0, window_bounds = array<i64: 1, 100, 288>}, {pipeline_mode = #tpu.pipeline_mode<synchronous>, transform_indices = @transform_1, window_bounds = array<i64: 8, 100>}, {pipeline_mode = #tpu.pipeline_mode<synchronous>, transform_indices = @transform_2, window_bounds = array<i64: 8, 1>}, {pipeline_mode = #tpu.pipeline_mode<synchronous>, transform_indices = @transform_3, window_bounds = array<i64: 9, 8, 8>}, {pipeline_mode = #tpu.pipeline_mode<synchronous>, transform_indices = @transform_4, window_bounds = array<i64: 8, 1>}, {pipeline_mode = #tpu.pipeline_mode<synchronous>, transform_indices = @transform_5, window_bounds = array<i64: 4, 32, 8>}, {pipeline_mode = #tpu.pipeline_mode<synchronous>, transform_indices = @transform_6, window_bounds = array<i64: 32, 1>}, {transform_indices = @transform_7, window_bounds = array<i64: 1, 32, 8>}]} {
    %c0 = arith.constant 0 : index
    %c0_0 = arith.constant 0 : index
    %0 = vector.load %arg2[%c0, %c0_0] : memref<8x100xbf16, #tpu.memory_space<vmem>>, vector<8x100xbf16>
    %c0_1 = arith.constant 0 : index
    %c0_2 = arith.constant 0 : index
    %c0_3 = arith.constant 0 : index
    %1 = vector.load %arg1[%c0_1, %c0_2, %c0_3] : memref<1x100x288xbf16, #tpu.memory_space<vmem>>, vector<1x100x288xbf16>
    %2 = vector.shape_cast %1 : vector<1x100x288xbf16> to vector<100x288xbf16>
    %cst = arith.constant dense<0.000000e+00> : vector<8x288xf32>
    %3 = tpu.matmul %0, %2, %cst {dimension_numbers = #tpu.dot_dimension_numbers<[1], [0], [0], [1], [0, 0, 1, 1], [], []>} : vector<8x100xbf16>, vector<100x288xbf16>, vector<8x288xf32> -> vector<8x288xf32>
    %c0_4 = arith.constant 0 : index
    %c0_5 = arith.constant 0 : index
    %4 = vector.load %arg3[%c0_4, %c0_5] : memref<8x1xf32, #tpu.memory_space<vmem>>, vector<8x1xf32>
    %5 = vector.broadcast %4 : vector<8x1xf32> to vector<8x288xf32>
    %6 = arith.addf %3, %5 : vector<8x288xf32>
    %cst_6 = arith.constant 2.000000e-01 : f32
    %7 = vector.broadcast %cst_6 : f32 to vector<8x288xf32>
    %8 = arith.mulf %7, %6 : vector<8x288xf32>
    %9 = arith.maximumf %6, %8 : vector<8x288xf32>
    %10 = arith.truncf %9 : vector<8x288xf32> to vector<8x288xbf16>
    %c0_7 = arith.constant 0 : index
    %c0_8 = arith.constant 0 : index
    %c0_9 = arith.constant 0 : index
    %11 = vector.load %arg4[%c0_7, %c0_8, %c0_9] : memref<9x8x8xbf16, #tpu.memory_space<vmem>>, vector<9x8x8xbf16>
    %c0_10 = arith.constant 0 : index
    %c0_11 = arith.constant 0 : index
    %12 = vector.load %arg5[%c0_10, %c0_11] : memref<8x1xf32, #tpu.memory_space<vmem>>, vector<8x1xf32>
    %13 = vector.extract_strided_slice %10 {offsets = [0, 0], sizes = [8, 8], strides = [1, 1]} : vector<8x288xbf16> to vector<8x8xbf16>
    %14 = vector.extract_strided_slice %10 {offsets = [0, 16], sizes = [8, 8], strides = [1, 1]} : vector<8x288xbf16> to vector<8x8xbf16>
    %15 = vector.extract_strided_slice %10 {offsets = [0, 96], sizes = [8, 8], strides = [1, 1]} : vector<8x288xbf16> to vector<8x8xbf16>
    %16 = vector.extract_strided_slice %10 {offsets = [0, 112], sizes = [8, 8], strides = [1, 1]} : vector<8x288xbf16> to vector<8x8xbf16>
    %17 = tpu.concatenate %13, %14, %15, %16 in 1 : vector<8x8xbf16>, vector<8x8xbf16>, vector<8x8xbf16>, vector<8x8xbf16> -> vector<8x32xbf16>
    %18 = vector.extract_strided_slice %11 {offsets = [0, 0, 0], sizes = [1, 8, 8], strides = [1, 1, 1]} : vector<9x8x8xbf16> to vector<1x8x8xbf16>
    %19 = vector.shape_cast %18 : vector<1x8x8xbf16> to vector<8x8xbf16>
    %cst_12 = arith.constant dense<0.000000e+00> : vector<8x32xf32>
    %20 = tpu.matmul %19, %17, %cst_12 {dimension_numbers = #tpu.dot_dimension_numbers<[1], [0], [0], [1], [0, 0, 1, 1], [], []>} : vector<8x8xbf16>, vector<8x32xbf16>, vector<8x32xf32> -> vector<8x32xf32>
    %21 = vector.extract_strided_slice %10 {offsets = [0, 8], sizes = [8, 8], strides = [1, 1]} : vector<8x288xbf16> to vector<8x8xbf16>
    %22 = vector.extract_strided_slice %10 {offsets = [0, 24], sizes = [8, 8], strides = [1, 1]} : vector<8x288xbf16> to vector<8x8xbf16>
    %23 = vector.extract_strided_slice %10 {offsets = [0, 104], sizes = [8, 8], strides = [1, 1]} : vector<8x288xbf16> to vector<8x8xbf16>
    %24 = vector.extract_strided_slice %10 {offsets = [0, 120], sizes = [8, 8], strides = [1, 1]} : vector<8x288xbf16> to vector<8x8xbf16>
    %25 = tpu.concatenate %21, %22, %23, %24 in 1 : vector<8x8xbf16>, vector<8x8xbf16>, vector<8x8xbf16>, vector<8x8xbf16> -> vector<8x32xbf16>
    %26 = vector.extract_strided_slice %11 {offsets = [1, 0, 0], sizes = [1, 8, 8], strides = [1, 1, 1]} : vector<9x8x8xbf16> to vector<1x8x8xbf16>
    %27 = vector.shape_cast %26 : vector<1x8x8xbf16> to vector<8x8xbf16>
    %cst_13 = arith.constant dense<0.000000e+00> : vector<8x32xf32>
    %28 = tpu.matmul %27, %25, %cst_13 {dimension_numbers = #tpu.dot_dimension_numbers<[1], [0], [0], [1], [0, 0, 1, 1], [], []>} : vector<8x8xbf16>, vector<8x32xbf16>, vector<8x32xf32> -> vector<8x32xf32>
    %29 = arith.addf %20, %28 : vector<8x32xf32>
    %30 = vector.extract_strided_slice %10 {offsets = [0, 16], sizes = [8, 8], strides = [1, 1]} : vector<8x288xbf16> to vector<8x8xbf16>
    %31 = vector.extract_strided_slice %10 {offsets = [0, 32], sizes = [8, 8], strides = [1, 1]} : vector<8x288xbf16> to vector<8x8xbf16>
    %32 = vector.extract_strided_slice %10 {offsets = [0, 112], sizes = [8, 8], strides = [1, 1]} : vector<8x288xbf16> to vector<8x8xbf16>
    %33 = vector.extract_strided_slice %10 {offsets = [0, 128], sizes = [8, 8], strides = [1, 1]} : vector<8x288xbf16> to vector<8x8xbf16>
    %34 = tpu.concatenate %30, %31, %32, %33 in 1 : vector<8x8xbf16>, vector<8x8xbf16>, vector<8x8xbf16>, vector<8x8xbf16> -> vector<8x32xbf16>
    %35 = vector.extract_strided_slice %11 {offsets = [2, 0, 0], sizes = [1, 8, 8], strides = [1, 1, 1]} : vector<9x8x8xbf16> to vector<1x8x8xbf16>
    %36 = vector.shape_cast %35 : vector<1x8x8xbf16> to vector<8x8xbf16>
    %cst_14 = arith.constant dense<0.000000e+00> : vector<8x32xf32>
    %37 = tpu.matmul %36, %34, %cst_14 {dimension_numbers = #tpu.dot_dimension_numbers<[1], [0], [0], [1], [0, 0, 1, 1], [], []>} : vector<8x8xbf16>, vector<8x32xbf16>, vector<8x32xf32> -> vector<8x32xf32>
    %38 = arith.addf %29, %37 : vector<8x32xf32>
    %39 = vector.extract_strided_slice %10 {offsets = [0, 48], sizes = [8, 8], strides = [1, 1]} : vector<8x288xbf16> to vector<8x8xbf16>
    %40 = vector.extract_strided_slice %10 {offsets = [0, 64], sizes = [8, 8], strides = [1, 1]} : vector<8x288xbf16> to vector<8x8xbf16>
    %41 = vector.extract_strided_slice %10 {offsets = [0, 144], sizes = [8, 8], strides = [1, 1]} : vector<8x288xbf16> to vector<8x8xbf16>
    %42 = vector.extract_strided_slice %10 {offsets = [0, 160], sizes = [8, 8], strides = [1, 1]} : vector<8x288xbf16> to vector<8x8xbf16>
    %43 = tpu.concatenate %39, %40, %41, %42 in 1 : vector<8x8xbf16>, vector<8x8xbf16>, vector<8x8xbf16>, vector<8x8xbf16> -> vector<8x32xbf16>
    %44 = vector.extract_strided_slice %11 {offsets = [3, 0, 0], sizes = [1, 8, 8], strides = [1, 1, 1]} : vector<9x8x8xbf16> to vector<1x8x8xbf16>
    %45 = vector.shape_cast %44 : vector<1x8x8xbf16> to vector<8x8xbf16>
    %cst_15 = arith.constant dense<0.000000e+00> : vector<8x32xf32>
    %46 = tpu.matmul %45, %43, %cst_15 {dimension_numbers = #tpu.dot_dimension_numbers<[1], [0], [0], [1], [0, 0, 1, 1], [], []>} : vector<8x8xbf16>, vector<8x32xbf16>, vector<8x32xf32> -> vector<8x32xf32>
    %47 = arith.addf %38, %46 : vector<8x32xf32>
    %48 = vector.extract_strided_slice %10 {offsets = [0, 56], sizes = [8, 8], strides = [1, 1]} : vector<8x288xbf16> to vector<8x8xbf16>
    %49 = vector.extract_strided_slice %10 {offsets = [0, 72], sizes = [8, 8], strides = [1, 1]} : vector<8x288xbf16> to vector<8x8xbf16>
    %50 = vector.extract_strided_slice %10 {offsets = [0, 152], sizes = [8, 8], strides = [1, 1]} : vector<8x288xbf16> to vector<8x8xbf16>
    %51 = vector.extract_strided_slice %10 {offsets = [0, 168], sizes = [8, 8], strides = [1, 1]} : vector<8x288xbf16> to vector<8x8xbf16>
    %52 = tpu.concatenate %48, %49, %50, %51 in 1 : vector<8x8xbf16>, vector<8x8xbf16>, vector<8x8xbf16>, vector<8x8xbf16> -> vector<8x32xbf16>
    %53 = vector.extract_strided_slice %11 {offsets = [4, 0, 0], sizes = [1, 8, 8], strides = [1, 1, 1]} : vector<9x8x8xbf16> to vector<1x8x8xbf16>
    %54 = vector.shape_cast %53 : vector<1x8x8xbf16> to vector<8x8xbf16>
    %cst_16 = arith.constant dense<0.000000e+00> : vector<8x32xf32>
    %55 = tpu.matmul %54, %52, %cst_16 {dimension_numbers = #tpu.dot_dimension_numbers<[1], [0], [0], [1], [0, 0, 1, 1], [], []>} : vector<8x8xbf16>, vector<8x32xbf16>, vector<8x32xf32> -> vector<8x32xf32>
    %56 = arith.addf %47, %55 : vector<8x32xf32>
    %57 = vector.extract_strided_slice %10 {offsets = [0, 64], sizes = [8, 8], strides = [1, 1]} : vector<8x288xbf16> to vector<8x8xbf16>
    %58 = vector.extract_strided_slice %10 {offsets = [0, 80], sizes = [8, 8], strides = [1, 1]} : vector<8x288xbf16> to vector<8x8xbf16>
    %59 = vector.extract_strided_slice %10 {offsets = [0, 160], sizes = [8, 8], strides = [1, 1]} : vector<8x288xbf16> to vector<8x8xbf16>
    %60 = vector.extract_strided_slice %10 {offsets = [0, 176], sizes = [8, 8], strides = [1, 1]} : vector<8x288xbf16> to vector<8x8xbf16>
    %61 = tpu.concatenate %57, %58, %59, %60 in 1 : vector<8x8xbf16>, vector<8x8xbf16>, vector<8x8xbf16>, vector<8x8xbf16> -> vector<8x32xbf16>
    %62 = vector.extract_strided_slice %11 {offsets = [5, 0, 0], sizes = [1, 8, 8], strides = [1, 1, 1]} : vector<9x8x8xbf16> to vector<1x8x8xbf16>
    %63 = vector.shape_cast %62 : vector<1x8x8xbf16> to vector<8x8xbf16>
    %cst_17 = arith.constant dense<0.000000e+00> : vector<8x32xf32>
    %64 = tpu.matmul %63, %61, %cst_17 {dimension_numbers = #tpu.dot_dimension_numbers<[1], [0], [0], [1], [0, 0, 1, 1], [], []>} : vector<8x8xbf16>, vector<8x32xbf16>, vector<8x32xf32> -> vector<8x32xf32>
    %65 = arith.addf %56, %64 : vector<8x32xf32>
    %66 = vector.extract_strided_slice %10 {offsets = [0, 96], sizes = [8, 8], strides = [1, 1]} : vector<8x288xbf16> to vector<8x8xbf16>
    %67 = vector.extract_strided_slice %10 {offsets = [0, 112], sizes = [8, 8], strides = [1, 1]} : vector<8x288xbf16> to vector<8x8xbf16>
    %68 = vector.extract_strided_slice %10 {offsets = [0, 192], sizes = [8, 8], strides = [1, 1]} : vector<8x288xbf16> to vector<8x8xbf16>
    %69 = vector.extract_strided_slice %10 {offsets = [0, 208], sizes = [8, 8], strides = [1, 1]} : vector<8x288xbf16> to vector<8x8xbf16>
    %70 = tpu.concatenate %66, %67, %68, %69 in 1 : vector<8x8xbf16>, vector<8x8xbf16>, vector<8x8xbf16>, vector<8x8xbf16> -> vector<8x32xbf16>
    %71 = vector.extract_strided_slice %11 {offsets = [6, 0, 0], sizes = [1, 8, 8], strides = [1, 1, 1]} : vector<9x8x8xbf16> to vector<1x8x8xbf16>
    %72 = vector.shape_cast %71 : vector<1x8x8xbf16> to vector<8x8xbf16>
    %cst_18 = arith.constant dense<0.000000e+00> : vector<8x32xf32>
    %73 = tpu.matmul %72, %70, %cst_18 {dimension_numbers = #tpu.dot_dimension_numbers<[1], [0], [0], [1], [0, 0, 1, 1], [], []>} : vector<8x8xbf16>, vector<8x32xbf16>, vector<8x32xf32> -> vector<8x32xf32>
    %74 = arith.addf %65, %73 : vector<8x32xf32>
    %75 = vector.extract_strided_slice %10 {offsets = [0, 104], sizes = [8, 8], strides = [1, 1]} : vector<8x288xbf16> to vector<8x8xbf16>
    %76 = vector.extract_strided_slice %10 {offsets = [0, 120], sizes = [8, 8], strides = [1, 1]} : vector<8x288xbf16> to vector<8x8xbf16>
    %77 = vector.extract_strided_slice %10 {offsets = [0, 200], sizes = [8, 8], strides = [1, 1]} : vector<8x288xbf16> to vector<8x8xbf16>
    %78 = vector.extract_strided_slice %10 {offsets = [0, 216], sizes = [8, 8], strides = [1, 1]} : vector<8x288xbf16> to vector<8x8xbf16>
    %79 = tpu.concatenate %75, %76, %77, %78 in 1 : vector<8x8xbf16>, vector<8x8xbf16>, vector<8x8xbf16>, vector<8x8xbf16> -> vector<8x32xbf16>
    %80 = vector.extract_strided_slice %11 {offsets = [7, 0, 0], sizes = [1, 8, 8], strides = [1, 1, 1]} : vector<9x8x8xbf16> to vector<1x8x8xbf16>
    %81 = vector.shape_cast %80 : vector<1x8x8xbf16> to vector<8x8xbf16>
    %cst_19 = arith.constant dense<0.000000e+00> : vector<8x32xf32>
    %82 = tpu.matmul %81, %79, %cst_19 {dimension_numbers = #tpu.dot_dimension_numbers<[1], [0], [0], [1], [0, 0, 1, 1], [], []>} : vector<8x8xbf16>, vector<8x32xbf16>, vector<8x32xf32> -> vector<8x32xf32>
    %83 = arith.addf %74, %82 : vector<8x32xf32>
    %84 = vector.extract_strided_slice %10 {offsets = [0, 112], sizes = [8, 8], strides = [1, 1]} : vector<8x288xbf16> to vector<8x8xbf16>
    %85 = vector.extract_strided_slice %10 {offsets = [0, 128], sizes = [8, 8], strides = [1, 1]} : vector<8x288xbf16> to vector<8x8xbf16>
    %86 = vector.extract_strided_slice %10 {offsets = [0, 208], sizes = [8, 8], strides = [1, 1]} : vector<8x288xbf16> to vector<8x8xbf16>
    %87 = vector.extract_strided_slice %10 {offsets = [0, 224], sizes = [8, 8], strides = [1, 1]} : vector<8x288xbf16> to vector<8x8xbf16>
    %88 = tpu.concatenate %84, %85, %86, %87 in 1 : vector<8x8xbf16>, vector<8x8xbf16>, vector<8x8xbf16>, vector<8x8xbf16> -> vector<8x32xbf16>
    %89 = vector.extract_strided_slice %11 {offsets = [8, 0, 0], sizes = [1, 8, 8], strides = [1, 1, 1]} : vector<9x8x8xbf16> to vector<1x8x8xbf16>
    %90 = vector.shape_cast %89 : vector<1x8x8xbf16> to vector<8x8xbf16>
    %cst_20 = arith.constant dense<0.000000e+00> : vector<8x32xf32>
    %91 = tpu.matmul %90, %88, %cst_20 {dimension_numbers = #tpu.dot_dimension_numbers<[1], [0], [0], [1], [0, 0, 1, 1], [], []>} : vector<8x8xbf16>, vector<8x32xbf16>, vector<8x32xf32> -> vector<8x32xf32>
    %92 = arith.addf %83, %91 : vector<8x32xf32>
    %93 = vector.broadcast %12 : vector<8x1xf32> to vector<8x32xf32>
    %94 = arith.addf %92, %93 : vector<8x32xf32>
    %cst_21 = arith.constant 2.000000e-01 : f32
    %95 = vector.broadcast %cst_21 : f32 to vector<8x32xf32>
    %96 = arith.mulf %95, %94 : vector<8x32xf32>
    %97 = arith.maximumf %94, %96 : vector<8x32xf32>
    %98 = arith.truncf %97 : vector<8x32xf32> to vector<8x32xbf16>
    %c0_22 = arith.constant 0 : index
    %c0_23 = arith.constant 0 : index
    %c0_24 = arith.constant 0 : index
    %99 = vector.load %arg6[%c0_22, %c0_23, %c0_24] : memref<4x32x8xbf16, #tpu.memory_space<vmem>>, vector<4x32x8xbf16>
    %cst_25 = arith.constant 0.000000e+00 : f32
    %100 = vector.broadcast %cst_25 : f32 to vector<32x8xf32>
    %101 = vector.extract_strided_slice %99 {offsets = [0, 0, 0], sizes = [1, 32, 8], strides = [1, 1, 1]} : vector<4x32x8xbf16> to vector<1x32x8xbf16>
    %102 = vector.shape_cast %101 : vector<1x32x8xbf16> to vector<32x8xbf16>
    %103 = vector.extract_strided_slice %98 {offsets = [0, 0], sizes = [8, 8], strides = [1, 1]} : vector<8x32xbf16> to vector<8x8xbf16>
    %cst_26 = arith.constant dense<0.000000e+00> : vector<32x8xf32>
    %104 = tpu.matmul %102, %103, %cst_26 {dimension_numbers = #tpu.dot_dimension_numbers<[1], [0], [0], [1], [0, 0, 1, 1], [], []>} : vector<32x8xbf16>, vector<8x8xbf16>, vector<32x8xf32> -> vector<32x8xf32>
    %105 = arith.addf %100, %104 : vector<32x8xf32>
    %106 = vector.extract_strided_slice %99 {offsets = [1, 0, 0], sizes = [1, 32, 8], strides = [1, 1, 1]} : vector<4x32x8xbf16> to vector<1x32x8xbf16>
    %107 = vector.shape_cast %106 : vector<1x32x8xbf16> to vector<32x8xbf16>
    %108 = vector.extract_strided_slice %98 {offsets = [0, 8], sizes = [8, 8], strides = [1, 1]} : vector<8x32xbf16> to vector<8x8xbf16>
    %cst_27 = arith.constant dense<0.000000e+00> : vector<32x8xf32>
    %109 = tpu.matmul %107, %108, %cst_27 {dimension_numbers = #tpu.dot_dimension_numbers<[1], [0], [0], [1], [0, 0, 1, 1], [], []>} : vector<32x8xbf16>, vector<8x8xbf16>, vector<32x8xf32> -> vector<32x8xf32>
    %110 = arith.addf %105, %109 : vector<32x8xf32>
    %111 = vector.extract_strided_slice %99 {offsets = [2, 0, 0], sizes = [1, 32, 8], strides = [1, 1, 1]} : vector<4x32x8xbf16> to vector<1x32x8xbf16>
    %112 = vector.shape_cast %111 : vector<1x32x8xbf16> to vector<32x8xbf16>
    %113 = vector.extract_strided_slice %98 {offsets = [0, 16], sizes = [8, 8], strides = [1, 1]} : vector<8x32xbf16> to vector<8x8xbf16>
    %cst_28 = arith.constant dense<0.000000e+00> : vector<32x8xf32>
    %114 = tpu.matmul %112, %113, %cst_28 {dimension_numbers = #tpu.dot_dimension_numbers<[1], [0], [0], [1], [0, 0, 1, 1], [], []>} : vector<32x8xbf16>, vector<8x8xbf16>, vector<32x8xf32> -> vector<32x8xf32>
    %115 = arith.addf %110, %114 : vector<32x8xf32>
    %116 = vector.extract_strided_slice %99 {offsets = [3, 0, 0], sizes = [1, 32, 8], strides = [1, 1, 1]} : vector<4x32x8xbf16> to vector<1x32x8xbf16>
    %117 = vector.shape_cast %116 : vector<1x32x8xbf16> to vector<32x8xbf16>
    %118 = vector.extract_strided_slice %98 {offsets = [0, 24], sizes = [8, 8], strides = [1, 1]} : vector<8x32xbf16> to vector<8x8xbf16>
    %cst_29 = arith.constant dense<0.000000e+00> : vector<32x8xf32>
    %119 = tpu.matmul %117, %118, %cst_29 {dimension_numbers = #tpu.dot_dimension_numbers<[1], [0], [0], [1], [0, 0, 1, 1], [], []>} : vector<32x8xbf16>, vector<8x8xbf16>, vector<32x8xf32> -> vector<32x8xf32>
    %120 = arith.addf %115, %119 : vector<32x8xf32>
    %c0_30 = arith.constant 0 : index
    %c0_31 = arith.constant 0 : index
    %121 = vector.load %arg7[%c0_30, %c0_31] : memref<32x1xf32, #tpu.memory_space<vmem>>, vector<32x1xf32>
    %122 = vector.broadcast %121 : vector<32x1xf32> to vector<32x8xf32>
    %123 = arith.addf %120, %122 : vector<32x8xf32>
    %c0_32 = arith.constant 0 : index
    %c0_33 = arith.constant 0 : index
    %c0_34 = arith.constant 0 : index
    %124 = vector.load %arg8[%c0_32, %c0_33, %c0_34] : memref<1x32x8xf32, #tpu.memory_space<vmem>>, vector<1x32x8xf32>
    %125 = vector.shape_cast %124 : vector<1x32x8xf32> to vector<32x8xf32>
    %126 = vector.shape_cast %123 : vector<32x8xf32> to vector<1x32x8xf32>
    tpu.vector_store %arg8[%c0_32, %c0_33, %c0_34], %126 {strides = array<i32>} : memref<1x32x8xf32, #tpu.memory_space<vmem>>, vector<1x32x8xf32>,
    return
  }
  func.func @transform_0(%arg0: i32) -> (i32, i32, i32) {
    %c0_i32 = arith.constant 0 : i32
    %c0_i32_0 = arith.constant 0 : i32
    %c0_i32_1 = arith.constant 0 : i32
    return %arg0, %c0_i32, %c0_i32_0 : i32, i32, i32
  }
  func.func @transform_1(%arg0: i32) -> (i32, i32) {
    %c0_i32 = arith.constant 0 : i32
    %c0_i32_0 = arith.constant 0 : i32
    %c0_i32_1 = arith.constant 0 : i32
    return %c0_i32, %c0_i32_0 : i32, i32
  }
  func.func @transform_2(%arg0: i32) -> (i32, i32) {
    %c0_i32 = arith.constant 0 : i32
    %c0_i32_0 = arith.constant 0 : i32
    %c0_i32_1 = arith.constant 0 : i32
    return %c0_i32, %c0_i32_0 : i32, i32
  }
  func.func @transform_3(%arg0: i32) -> (i32, i32, i32) {
    %c0_i32 = arith.constant 0 : i32
    %c0_i32_0 = arith.constant 0 : i32
    %c0_i32_1 = arith.constant 0 : i32
    %c0_i32_2 = arith.constant 0 : i32
    return %c0_i32, %c0_i32_0, %c0_i32_1 : i32, i32, i32
  }
  func.func @transform_4(%arg0: i32) -> (i32, i32) {
    %c0_i32 = arith.constant 0 : i32
    %c0_i32_0 = arith.constant 0 : i32
    %c0_i32_1 = arith.constant 0 : i32
    return %c0_i32, %c0_i32_0 : i32, i32
  }
  func.func @transform_5(%arg0: i32) -> (i32, i32, i32) {
    %c0_i32 = arith.constant 0 : i32
    %c0_i32_0 = arith.constant 0 : i32
    %c0_i32_1 = arith.constant 0 : i32
    %c0_i32_2 = arith.constant 0 : i32
    return %c0_i32, %c0_i32_0, %c0_i32_1 : i32, i32, i32
  }
  func.func @transform_6(%arg0: i32) -> (i32, i32) {
    %c0_i32 = arith.constant 0 : i32
    %c0_i32_0 = arith.constant 0 : i32
    %c0_i32_1 = arith.constant 0 : i32
    return %c0_i32, %c0_i32_0 : i32, i32
  }
  func.func @transform_7(%arg0: i32) -> (i32, i32, i32) {
    %c0_i32 = arith.constant 0 : i32
    %c0_i32_0 = arith.constant 0 : i32
    %c0_i32_1 = arith.constant 0 : i32
    return %arg0, %c0_i32, %c0_i32_0 : i32, i32, i32
  }
}

</mosaic_0001>

<bundles_post_ra>
// kernel: tpu_custom_call.1
= control target key start
LH: loop header
LB: loop body
LE: loop exit
PB: predicated region body
PF: predicated region fallthrough
CT: control target
= control target key end

     0   :  { %v1249_v1 = vmov 0   ;;  %vm116_vm0 = vcmask 1041408   ;;  %vm112_vm1 = vcmask 818176   ;;  %v1250_v23 = vmov 0.0   ;;  %s1254_s30 = smov 40   ;;  %s1255_s8 = smov 112   ;;  %s1541_s0 = inlined_call_operand.vmem [shape: bf16[1,100,288], index: 0, kind: input, shape index: {}]   ;;  %s1542_s2 = inlined_call_operand.vmem [shape: f32[8,1], index: 2, kind: input, shape index: {}]   ;;  %s1543_s1 = inlined_call_operand.vmem [shape: bf16[8,100], index: 1, kind: input, shape index: {}]   ;;  %s1544_s4 = inlined_call_operand.vmem [shape: f32[8,1], index: 4, kind: input, shape index: {}]   ;;  %s1545_s3 = inlined_call_operand.vmem [shape: bf16[9,8,8], index: 3, kind: input, shape index: {}]   ;;  %s1546_s5 = inlined_call_operand.vmem [shape: bf16[4,32,8], index: 5, kind: input, shape index: {}]   ;;  %s1547_s6 = inlined_call_operand.vmem [shape: f32[32,1], index: 6, kind: input, shape index: {}]   ;;  %s1548_s7 = inlined_call_operand.vmem [shape: f32[1,32,8], index: 7, kind: output, shape index: {}]  }
   0x1   :  { %v1221_v0 = vld [vmem:[%s1541_s0 + $0x4] ss:$12 sps:$4 sm:$0xff]   ;;  %155 = vmatprep.mubr.bf16.mxu0 %v1249_v1  ;;  %1219 = vset.pattern.permute.xlu0 %v1249_v1  ;;  %v1223_v2 = vld [vmem:[%s1541_s0] ss:$12 sps:$4 sm:$0xff]   ;;  %v1224_v3 = vld [vmem:[%s1541_s0 + $0x1c] ss:$12 sps:$4 sm:$0xff]  }
   0x2   :  { %1220 = vset.pattern.permute.xlu1 %v1249_v1  ;;  %123 = vmatprep.subr.bf16.mxu0 %v1221_v0  ;;  %v1226_v4 = vld [vmem:[%s1541_s0 + $0x18] ss:$12 sps:$4 sm:$0xff]   ;;  %v1227_v5 = vld [vmem:[%s1541_s0 + $0x34] ss:$12 sps:$4 sm:$0xff]   ;;  %v1229_v6 = vld [vmem:[%s1541_s0 + $0x30] ss:$12 sps:$4 sm:$0xff]  }
   0x3   :  { %124 = vmatpush1.bf16.msra.mxu0 %v1223_v2  ;;  %v1230_v7 = vld [vmem:[%s1541_s0 + $0x4c] ss:$12 sps:$4 sm:$0xff]   ;;  %v41_v8 = vld [vmem:[%s1542_s2] sm:$0xff]  ;;  %v1232_v9 = vld [vmem:[%s1541_s0 + $0x48] ss:$12 sps:$4 sm:$0xff]   ;;  %1115 = vmatprep.subr.bf16.mxu1 %v1250_v23  ;;  %vm1251_vm2 = vmmov 0  }
   0x4   :  { %125 = vmatprep.subr.bf16.mxu0 %v1224_v3  ;;  %44 = vperm.xlu0 %1219, %v41_v8   ;;  %v1233_v10 = vld [vmem:[%s1541_s0 + $0x64] ss:$12 sps:$4 sm:$0xff]   ;;  %v1235_v11 = vld [vmem:[%s1541_s0 + $0x60] ss:$12 sps:$4 sm:$0xff]   ;;  %v1236_v12 = vld [vmem:[%s1541_s0 + $0x7c] ss:$12 sps:$4 sm:$0xff]  }
   0x5   :  { %v40_v13 = vld [vmem:[%s1541_s0 + $0x90] sm:$0x33]  ;;  %v1238_v14 = vld [vmem:[%s1541_s0 + $0x78] ss:$12 sps:$4 sm:$0xff]   ;;  %v27_v18 = vld [vmem:[%s1543_s1] sm:$0xf]  ;;  %1117 = vmatprep.mubr.msk.bf16.mxu1 %vm1251_vm2, %v1250_v23 }
   0x6   :  { %v1051_v15 = vcombine.high %v40_v13, %v40_v13  ;;  %v1050_v16 = vcombine.low %v40_v13, %v40_v13  ;;  %s1252_s0 = smov 48   ;;  %s1253_s1 = smov 120   ;;  %v179_v33 = vld [vmem:[%s1544_s4] sm:$0xff]  ;;  %vm187_vm3 = vcmask 64512   ;;  %vm191_vm4 = vcmask 130048  }
   0x7   :  { %126 = vmatpush1.bf16.msra.mxu0 %v1226_v4  ;;  %s1256_s9 = smov 104   ;;  %s1257_s10 = smov 32   ;;  %vm194_vm5 = vcmask 195584   ;;  %vm209_vm6 = vcmask 1043456   ;;  %v170_v43 = vld [vmem:[%s1545_s3] sm:$0xf] }
   0x8   :  { %127 = vmatprep.subr.bf16.mxu0 %v1227_v5  ;;  %v118_v17 = vsel %vm116_vm0, %v1050_v16, 0  ;;  %s1258_s11 = smov 24   ;;  %s1259_s12 = smov 80   ;;  %v171_v50 = vld [vmem:[%s1545_s3 + $0x4] sm:$0xf] }
   0x9   :  { %s1260_s13 = smov 72   ;;  %s1261_s14 = smov 64   ;;  %v172_v56 = vld [vmem:[%s1545_s3 + $0x8] sm:$0xf]  ;;  %v173_v4 = vld [vmem:[%s1545_s3 + $0xc] sm:$0xf] }
   0xa   :  { %s1262_s15 = smov 56   ;;  %s1263_s16 = smov 16   ;;  %v175_v16 = vld [vmem:[%s1545_s3 + $0x14] sm:$0xf] }
   0xb   :  { %128 = vmatpush1.bf16.msra.mxu0 %v1229_v6  ;;  %s1264_s17 = smov 8  }
   0xc   :  { %129 = vmatprep.subr.bf16.mxu0 %v1230_v7 }
   0xf   :  { %130 = vmatpush1.bf16.msra.mxu0 %v1232_v9  ;;  %v174_v9 = vld [vmem:[%s1545_s3 + $0x10] sm:$0xf] }
  0x10   :  { %131 = vmatprep.subr.bf16.mxu0 %v1233_v10 }
  0x13   :  { %132 = vmatpush1.bf16.msra.mxu0 %v1235_v11 }
  0x14   :  { %133 = vmatprep.subr.bf16.mxu0 %v1236_v12 }
  0x17   :  { %134 = vmatpush1.bf16.msra.mxu0 %v1238_v14 }
  0x18   :  { %1052 = vmatprep.subr.msk.bf16.mxu0 %vm116_vm0, %v1051_v15 }
  0x1b   :  { %136 = vmatpush1.bf16.msra.mxu0 %v118_v17 }
  0x1c   :  { %1109 = vmatprep.subr.bf16.mxu0 %v1250_v23 }
  0x1e   :  { %1053 = vmatmul.mubr.msk.bf16.vlgmr.msra.gmra.mrb[0].mxu0 %vm112_vm1, %v27_v18 }
  0x1f   :  { %1111 = vmatprep.mubr.msk.bf16.mxu0 %vm1251_vm2, %v1250_v23 }
  0x83   :  { %v45_v19 = vpop.permute.xlu0 %44 }
  0xf1   :  { %v157_v20 = vpop.f32.mrb[0].mxu0 }
  0xf2   :  { %v158_v21 = vadd.f32 %v157_v20, %v45_v19  ;;  %v159_v22 = vpop.f32.mrb[1].mxu0 }
  0xf3   :  { %v161_v24 = vpop.f32.mrb[2].mxu0  ;;  %v160_v29 = vadd.f32 %v159_v22, %v45_v19 }
  0xf4   :  { %v164_v25 = vmul.f32 0.2, %v158_v21  ;;  %v162_v26 = vpop.f32.mrb[3].mxu0  ;;  %v176_v24 = vld [vmem:[%s1545_s3 + $0x18] sm:$0xf] }
  0xf5   :  { %v165_v30 = vmul.f32 0.2, %v160_v29 }
  0xf6   :  { %v166_v27 = vmax.f32 %v158_v21, %v164_v25 }
  0xf7   :  { %v167_v31 = vmax.f32 %v160_v29, %v165_v30 }
  0xf8   :  { %v168_v28 = vpack.c.bf16 %v166_v27, %v166_v27 }
  0xf9   :  { %v1359_v32 = vpack.c.bf16 %v167_v31, %v167_v31  ;;  %v177_v31 = vld [vmem:[%s1545_s3 + $0x1c] sm:$0xf] }
  0xfa   :  { %183 = vrot.lane.b32.xlu1 %v168_v28, %s1252_s0  ;;  %181 = vrot.lane.b32.xlu0 %v168_v28, %s1253_s1 }
  0xfe   :  { %185 = vrot.lane.b32.xlu1 %v168_v28, %s1254_s30  ;;  %197 = vrot.lane.b32.xlu0 %v168_v28, %s1255_s8 }
 0x102   :  { %297 = vrot.lane.b32.xlu1 %v168_v28, %s1256_s9  ;;  %199 = vrot.lane.b32.xlu0 %v168_v28, %s1257_s10 }
 0x106   :  { %300 = vrot.lane.b32.xlu1 %v1359_v32, %s1258_s11  ;;  %353 = vrot.lane.b32.xlu0 %v168_v28, %s1259_s12 }
 0x10a   :  { %355 = vrot.lane.b32.xlu1 %v168_v28, %s1260_s13  ;;  %357 = vrot.lane.b32.xlu0 %v1359_v32, %s1253_s1 }
 0x10e   :  { %412 = vrot.lane.b32.xlu1 %v168_v28, %s1261_s14  ;;  %414 = vrot.lane.b32.xlu0 %v1359_v32, %s1255_s8 }
 0x112   :  { %467 = vrot.lane.b32.xlu1 %v168_v28, %s1262_s15  ;;  %469 = vrot.lane.b32.xlu0 %v1359_v32, %s1256_s9 }
 0x116   :  { %522 = vrot.lane.b32.xlu1 %v168_v28, %s1258_s11  ;;  %524 = vrot.lane.b32.xlu0 %v1359_v32, %s1259_s12 }
 0x11a   :  { %526 = vrot.lane.b32.xlu1 %v1359_v32, %s1260_s13  ;;  %580 = vrot.lane.b32.xlu0 %v168_v28, %s1263_s16 }
 0x11e   :  { %582 = vrot.lane.b32.xlu1 %v1359_v32, %s1261_s14  ;;  %635 = vrot.lane.b32.xlu0 %v1359_v32, %s1264_s17 }
 0x122   :  { %637 = vrot.lane.b32.xlu1 %v1359_v32, %s1262_s15  ;;  %692 = vperm.xlu0 %1219, %v179_v33  }
 0x16c   :  { %v184_v34 = vpop.permute.xlu1 %183  ;;  %v182_v35 = vpop.permute.xlu0 %181 }
 0x16d   :  { %v190_v36 = vsel %vm187_vm3, %v168_v28, %v182_v35 }
 0x16e   :  { %v193_v39 = vsel %vm191_vm4, %v190_v36, %v184_v34  ;;  %v178_v36 = vld [vmem:[%s1545_s3 + $0x20] sm:$0xf] }
 0x170   :  { %v186_v37 = vpop.permute.xlu1 %185  ;;  %v198_v38 = vpop.permute.xlu0 %197 }
 0x171   :  { %v202_v40 = vsel %vm187_vm3, %v182_v35, %v198_v38  ;;  %v196_v41 = vsel %vm194_vm5, %v193_v39, %v186_v37 }
 0x172   :  { %v255_v42 = vsel %vm209_vm6, %v196_v41, 0  ;;  %v203_v44 = vsel %vm191_vm4, %v202_v40, %v186_v37 }
 0x173   :  { %1116 = vmatpush3.bf16.msra.mxu1 %v255_v42 }
 0x174   :  { %v298_v45 = vpop.permute.xlu1 %297  ;;  %v200_v46 = vpop.permute.xlu0 %199  ;;  %1121 = vmatprep.subr.bf16.mxu1 %v1250_v23 }
 0x175   :  { %v303_v47 = vsel %vm187_vm3, %v198_v38, %v298_v45  ;;  %v205_v48 = vsel %vm194_vm5, %v203_v44, %v200_v46 }
 0x176   :  { %1118 = vmatmul.mubr.msk.bf16.vlgmr.msra.gmra.mrb[0].mxu1 %vm187_vm3, %v170_v43  ;;  %v210_v49 = vsel %vm209_vm6, %v205_v48, 0  ;;  %v304_v51 = vsel %vm191_vm4, %v303_v47, %v200_v46 }
 0x177   :  { %1110 = vmatpush3.bf16.msra.mxu0 %v210_v49  ;;  %1123 = vmatprep.mubr.msk.bf16.mxu1 %vm1251_vm2, %v1250_v23 }
 0x178   :  { %v301_v52 = vpop.permute.xlu1 %300  ;;  %v354_v53 = vpop.permute.xlu0 %353  ;;  %1133 = vmatprep.subr.bf16.mxu0 %v1250_v23 }
 0x179   :  { %v306_v54 = vsel %vm194_vm5, %v304_v51, %v301_v52 }
 0x17a   :  { %v310_v55 = vsel %vm209_vm6, %v306_v54, 0  ;;  %1112 = vmatmul.mubr.msk.bf16.vlgmr.msra.gmra.mrb[4].mxu0 %vm187_vm3, %v171_v50 }
 0x17b   :  { %1122 = vmatpush3.bf16.msra.mxu1 %v310_v55  ;;  %1135 = vmatprep.mubr.msk.bf16.mxu0 %vm1251_vm2, %v1250_v23 }
 0x17c   :  { %v356_v57 = vpop.permute.xlu1 %355  ;;  %v358_v58 = vpop.permute.xlu0 %357  ;;  %1127 = vmatprep.subr.bf16.mxu1 %v1250_v23 }
 0x17d   :  { %v361_v59 = vsel %vm187_vm3, %v354_v53, %v356_v57 }
 0x17e   :  { %v363_v60 = vsel %vm191_vm4, %v361_v59, %v1359_v32  ;;  %1124 = vmatmul.mubr.msk.bf16.vlgmr.msra.gmra.mrb[4].mxu1 %vm187_vm3, %v172_v56 }
 0x17f   :  { %v365_v61 = vsel %vm194_vm5, %v363_v60, %v358_v58  ;;  %1129 = vmatprep.mubr.msk.bf16.mxu1 %vm1251_vm2, %v1250_v23 }
 0x180   :  { %v369_v62 = vsel %vm209_vm6, %v365_v61, 0  ;;  %v413_v63 = vpop.permute.xlu1 %412  ;;  %v415_v0 = vpop.permute.xlu0 %414 }
 0x181   :  { %v417_v1 = vsel %vm187_vm3, %v356_v57, %v413_v63  ;;  %1128 = vmatpush3.bf16.msra.mxu1 %v369_v62 }
 0x182   :  { %v418_v2 = vsel %vm191_vm4, %v417_v1, %v358_v58  ;;  %1139 = vmatprep.subr.bf16.mxu1 %v1250_v23 }
 0x183   :  { %v420_v3 = vsel %vm194_vm5, %v418_v2, %v415_v0 }
 0x184   :  { %v424_v5 = vsel %vm209_vm6, %v420_v3, 0  ;;  %v468_v6 = vpop.permute.xlu1 %467  ;;  %v470_v7 = vpop.permute.xlu0 %469 }
 0x185   :  { %v472_v8 = vsel %vm187_vm3, %v413_v63, %v468_v6  ;;  %1134 = vmatpush3.bf16.msra.mxu0 %v424_v5 }
 0x186   :  { %v473_v10 = vsel %vm191_vm4, %v472_v8, %v415_v0  ;;  %1130 = vmatmul.mubr.msk.bf16.vlgmr.msra.gmra.mrb[8].mxu1 %vm187_vm3, %v173_v4  ;;  %1145 = vmatprep.subr.bf16.mxu0 %v1250_v23 }
 0x187   :  { %v475_v11 = vsel %vm194_vm5, %v473_v10, %v470_v7  ;;  %1141 = vmatprep.mubr.msk.bf16.mxu1 %vm1251_vm2, %v1250_v23 }
 0x188   :  { %v479_v12 = vsel %vm209_vm6, %v475_v11, 0  ;;  %v523_v13 = vpop.permute.xlu1 %522  ;;  %1136 = vmatmul.mubr.msk.bf16.vlgmr.msra.gmra.mrb[8].mxu0 %vm187_vm3, %v174_v9  ;;  %v525_v14 = vpop.permute.xlu0 %524  ;;  %v1241_v11 = vld [vmem:[%s1546_s5 + $0x10] sm:$0xff]  }
 0x189   :  { %v529_v15 = vsel %vm187_vm3, %v200_v46, %v523_v13  ;;  %1140 = vmatpush3.bf16.msra.mxu1 %v479_v12  ;;  %1147 = vmatprep.mubr.msk.bf16.mxu0 %vm1251_vm2, %v1250_v23 }
 0x18a   :  { %1151 = vmatprep.subr.bf16.mxu1 %v1250_v23  ;;  %v531_v17 = vsel %vm191_vm4, %v529_v15, %v525_v14 }
 0x18c   :  { %v527_v18 = vpop.permute.xlu1 %526  ;;  %v581_v19 = vpop.permute.xlu0 %580 }
 0x18d   :  { %v533_v20 = vsel %vm194_vm5, %v531_v17, %v527_v18  ;;  %v585_v21 = vsel %vm187_vm3, %v523_v13, %v581_v19 }
 0x18e   :  { %v537_v22 = vsel %vm209_vm6, %v533_v20, 0  ;;  %1142 = vmatmul.mubr.msk.bf16.vlgmr.msra.gmra.mrb[12].mxu1 %vm187_vm3, %v175_v16  ;;  %v586_v26 = vsel %vm191_vm4, %v585_v21, %v527_v18 }
 0x18f   :  { %1146 = vmatpush3.bf16.msra.mxu0 %v537_v22  ;;  %1153 = vmatprep.mubr.msk.bf16.mxu1 %vm1251_vm2, %v1250_v23  ;;  %v1002_v22 = vld [vmem:[%s1547_s6] sm:$0xff] }
 0x190   :  { %v583_v25 = vpop.permute.xlu1 %582  ;;  %v636_v27 = vpop.permute.xlu0 %635  ;;  %1157 = vmatprep.subr.bf16.mxu0 %v1250_v23 }
 0x191   :  { %v588_v28 = vsel %vm194_vm5, %v586_v26, %v583_v25  ;;  %v640_v29 = vsel %vm187_vm3, %v581_v19, %v636_v27  ;;  %v1005_v26 = vld [vmem:[%s1547_s6 + $0x18] sm:$0xff] }
 0x192   :  { %v592_v30 = vsel %vm209_vm6, %v588_v28, 0  ;;  %1148 = vmatmul.mubr.msk.bf16.vlgmr.msra.gmra.mrb[12].mxu0 %vm187_vm3, %v176_v24  ;;  %v641_v33 = vsel %vm191_vm4, %v640_v29, %v583_v25  ;;  %v1004_v24 = vld [vmem:[%s1547_s6 + $0x10] sm:$0xff]  ;;  %v1003_v25 = vld [vmem:[%s1547_s6 + $0x8] sm:$0xff]  ;;  %v1242_v29 = vld [vmem:[%s1546_s5 + $0x18] sm:$0xff]  }
 0x193   :  { %1152 = vmatpush3.bf16.msra.mxu1 %v592_v30  ;;  %1159 = vmatprep.mubr.msk.bf16.mxu0 %vm1251_vm2, %v1250_v23  ;;  %v1243_v30 = vld [vmem:[%s1546_s5] sm:$0xff]  }
 0x194   :  { %v638_v32 = vpop.permute.xlu1 %637 }
 0x195   :  { %v643_v34 = vsel %vm194_vm5, %v641_v33, %v638_v32  ;;  %v1244_v33 = vld [vmem:[%s1546_s5 + $0x8] sm:$0xff]  }
 0x196   :  { %v647_v35 = vsel %vm209_vm6, %v643_v34, 0  ;;  %1154 = vmatmul.mubr.msk.bf16.vlgmr.msra.gmra.mrb[16].mxu1 %vm187_vm3, %v177_v31  ;;  %v1245_v34 = vld [vmem:[%s1546_s5 + $0x20] sm:$0xff]  }
 0x197   :  { %1158 = vmatpush3.bf16.msra.mxu0 %v647_v35  ;;  %1165 = vmatprep.mubr.msk.bf16.mxu1 %vm187_vm3, %v1241_v11 }
 0x19a   :  { %1160 = vmatmul.mubr.msk.bf16.vlgmr.msra.gmra.mrb[16].mxu0 %vm187_vm3, %v178_v36 }
 0x1a1   :  { %v693_v15 = vpop.permute.xlu0 %692 }
 0x249   :  { %v291_v37 = vpop.f32.mrb[0].mxu1 }
 0x24a   :  { %v1119_v38 = vpop.f32.mrb[1].mxu1 }
 0x24b   :  { %v294_v39 = vpop.f32.mrb[2].mxu1  ;;  %v1247_v38 = vld [vmem:[%s1546_s5 + $0x30] sm:$0xff]  }
 0x24c   :  { %v1120_v23 = vpop.f32.mrb[3].mxu1 }
 0x24d   :  { %v246_v40 = vpop.f32.mrb[4].mxu0  ;;  %v1248_v23 = vld [vmem:[%s1546_s5 + $0x38] sm:$0xff]  }
 0x24e   :  { %v292_v41 = vadd.f32 %v291_v37, %v246_v40  ;;  %v1113_v42 = vpop.f32.mrb[5].mxu0  ;;  %v1246_v37 = vld [vmem:[%s1546_s5 + $0x28] sm:$0xff]  }
 0x24f   :  { %v249_v43 = vpop.f32.mrb[6].mxu0 }
 0x250   :  { %v1114_v44 = vpop.f32.mrb[7].mxu0 }
 0x251   :  { %v346_v45 = vpop.f32.mrb[4].mxu1 }
 0x252   :  { %v352_v46 = vadd.f32 %v346_v45, %v292_v41  ;;  %v1125_v47 = vpop.f32.mrb[5].mxu1 }
 0x253   :  { %v349_v48 = vpop.f32.mrb[6].mxu1 }
 0x254   :  { %v1126_v49 = vpop.f32.mrb[7].mxu1 }
 0x259   :  { %v405_v50 = vpop.f32.mrb[8].mxu1 }
 0x25a   :  { %v411_v51 = vadd.f32 %v405_v50, %v352_v46  ;;  %v1131_v52 = vpop.f32.mrb[9].mxu1 }
 0x25b   :  { %v408_v53 = vpop.f32.mrb[10].mxu1  ;;  %v460_v54 = vpop.f32.mrb[8].mxu0 }
 0x25c   :  { %v466_v55 = vadd.f32 %v460_v54, %v411_v51  ;;  %v1132_v56 = vpop.f32.mrb[11].mxu1  ;;  %v1137_v57 = vpop.f32.mrb[9].mxu0 }
 0x25d   :  { %v463_v58 = vpop.f32.mrb[10].mxu0 }
 0x25e   :  { %v1138_v59 = vpop.f32.mrb[11].mxu0 }
 0x261   :  { %v515_v60 = vpop.f32.mrb[12].mxu1 }
 0x262   :  { %v521_v61 = vadd.f32 %v515_v60, %v466_v55  ;;  %v1143_v62 = vpop.f32.mrb[13].mxu1 }
 0x263   :  { %v518_v63 = vpop.f32.mrb[14].mxu1 }
 0x264   :  { %v1144_v0 = vpop.f32.mrb[15].mxu1 }
 0x265   :  { %v573_v1 = vpop.f32.mrb[12].mxu0 }
 0x266   :  { %v579_v2 = vadd.f32 %v573_v1, %v521_v61  ;;  %v1149_v3 = vpop.f32.mrb[13].mxu0 }
 0x267   :  { %v576_v4 = vpop.f32.mrb[14].mxu0 }
 0x268   :  { %v1150_v5 = vpop.f32.mrb[15].mxu0 }
 0x269   :  { %v628_v6 = vpop.f32.mrb[16].mxu1 }
 0x26a   :  { %v634_v7 = vadd.f32 %v628_v6, %v579_v2  ;;  %v1155_v8 = vpop.f32.mrb[17].mxu1 }
 0x26b   :  { %v631_v9 = vpop.f32.mrb[18].mxu1 }
 0x26c   :  { %v1156_v10 = vpop.f32.mrb[19].mxu1 }
 0x26d   :  { %v683_v12 = vpop.f32.mrb[16].mxu0 }
 0x26e   :  { %v689_v13 = vadd.f32 %v683_v12, %v634_v7  ;;  %v1161_v14 = vpop.f32.mrb[17].mxu0 }
 0x26f   :  { %v686_v16 = vpop.f32.mrb[18].mxu0 }
 0x270   :  { %v695_v17 = vadd.f32 %v693_v15, %v689_v13  ;;  %v1162_v18 = vpop.f32.mrb[19].mxu0 }
 0x272   :  { %v696_v19 = vmul.f32 0.2, %v695_v17 }
 0x274   :  { %v697_v20 = vmax.f32 %v695_v17, %v696_v19 }
 0x276   :  { %v698_v21 = vpack.c.bf16 %v697_v20, %v697_v20 }
 0x278   :  { %864 = vrot.lane.b32.xlu0 %v698_v21, %s1255_s8  ;;  %726 = vrot.lane.b32.xlu1 %v698_v21, %s1253_s1  ;;  %v803_v31 = vsel %vm209_vm6, %v698_v21, 0 }
 0x27c   :  { %1008 = vperm.xlu0 %1219, %v1002_v22   ;;  %938 = vrot.lane.b32.xlu1 %v698_v21, %s1256_s9 }
 0x280   :  { %1018 = vperm.xlu0 %1219, %v1004_v24   ;;  %1013 = vperm.xlu1 %1220, %v1003_v25  }
 0x284   :  { %1023 = vperm.xlu1 %1220, %v1005_v26  }
 0x2ea   :  { %v727_v27 = vpop.permute.xlu1 %726  ;;  %v865_v32 = vpop.permute.xlu0 %864 }
 0x2eb   :  { %v735_v28 = vsel %vm209_vm6, %v727_v27, 0  ;;  %1199 = vmatprep.subr.msk.bf16.mxu1 %vm209_vm6, %v727_v27  ;;  %v873_v35 = vsel %vm209_vm6, %v865_v32, 0 }
 0x2ec   :  { %1164 = vmatpush3.bf16.msra.mxu1 %v735_v28 }
 0x2ed   :  { %1200 = vmatprep.subr.msk.bf16.mxu1 %vm209_vm6, %v698_v21 }
 0x2ee   :  { %v939_v36 = vpop.permute.xlu1 %938 }
 0x2ef   :  { %1166 = vmatmul.mubr.msk.bf16.vlgmr.msra.gmra.mrb[20].mxu1 %vm187_vm3, %v1242_v29  ;;  %v947_v39 = vsel %vm209_vm6, %v939_v36, 0 }
 0x2f0   :  { %1170 = vmatpush3.bf16.msra.mxu1 %v803_v31  ;;  %1171 = vmatprep.mubr.msk.bf16.mxu1 %vm187_vm3, %v1243_v30 }
 0x2f1   :  { %1201 = vmatprep.subr.msk.bf16.mxu1 %vm209_vm6, %v865_v32 }
 0x2fb   :  { %1172 = vmatmul.mubr.msk.bf16.vlgmr.msra.gmra.mrb[20].mxu1 %vm187_vm3, %v1244_v33  ;;  %v1009_v40 = vpop.permute.xlu0 %1008 }
 0x2fc   :  { %1176 = vmatpush3.bf16.msra.mxu1 %v873_v35  ;;  %1177 = vmatprep.mubr.msk.bf16.mxu1 %vm187_vm3, %v1245_v34 }
 0x2fd   :  { %1202 = vmatprep.subr.msk.bf16.mxu1 %vm209_vm6, %v939_v36 }
 0x2ff   :  { %v1014_v41 = vpop.permute.xlu1 %1013  ;;  %v1019_v42 = vpop.permute.xlu0 %1018 }
 0x303   :  { %v1024_v47 = vpop.permute.xlu1 %1023 }
 0x307   :  { %1178 = vmatmul.mubr.msk.bf16.vlgmr.msra.gmra.mrb[20].mxu1 %vm187_vm3, %v1246_v37 }
 0x308   :  { %1182 = vmatpush3.bf16.msra.mxu1 %v947_v39  ;;  %1183 = vmatprep.mubr.msk.bf16.mxu1 %vm187_vm3, %v1247_v38 }
 0x313   :  { %1184 = vmatmul.mubr.msk.bf16.vlgmr.msra.gmra.mrb[20].mxu1 %vm187_vm3, %v1248_v23 }
 0x3e6   :  { %v1185_v43 = vpop.f32.mrb[20].mxu1 }
 0x3e7   :  { %v1028_v44 = vadd.f32 %v1185_v43, %v1019_v42  ;;  %v983_v45 = vpop.f32.mrb[21].mxu1 }
 0x3e8   :  { %v1026_v46 = vadd.f32 %v1009_v40, %v983_v45  ;;  %v1186_v48 = vpop.f32.mrb[22].mxu1 }
 0x3e9   :  { %1032 = vst.msk [vmem:[%s1548_s7 + $0x10] sm:$0xff] %vm187_vm3, %v1028_v44  ;;  %v1029_v49 = vadd.f32 %v1186_v48, %v1024_v47  ;;  %v986_v50 = vpop.f32.mrb[23].mxu1 }
 0x3ea   :  { %1030 = vst.msk [vmem:[%s1548_s7] sm:$0xff] %vm187_vm3, %v1026_v46  ;;  %v1027_v51 = vadd.f32 %v1014_v41, %v986_v50 }
 0x3eb   :  { %1033 = vst.msk [vmem:[%s1548_s7 + $0x18] sm:$0xff] %vm187_vm3, %v1029_v49 }
 0x3ec   :  { %1031 = vst.msk [vmem:[%s1548_s7 + $0x8] sm:$0xff] %vm187_vm3, %v1027_v51 }

</bundles_post_ra>
